<compile_context>
chip_gen: v6e
topology: v6e:2x2x1
jax: 0.10.0
libtpu: 0.0.40
codegen_flags: <defaults>
</compile_context>

<pallas_src>
import math
import numpy as np
import jax
import jax.numpy as jnp
from jax import lax
from jax.experimental import pallas as pl
from jax.experimental.pallas import tpu as pltpu


def _round_up(x, m):
    return -(-x // m) * m


def _round_down(x, m):
    return (x // m) * m


# ---------------------------------------------------------------------------
# Kernel: one (tm, tk) x (tk, tn) MXU panel per grid step, f32 accumulator in
# VMEM scratch, bias added and cast to the output dtype on the last K step.
# tk / tn are multiples of 128 -> dense vreg loads and unmasked stores.
# ---------------------------------------------------------------------------
def _orth_matmul_kernel(p_ref, w_ref, b_ref, o_ref, acc_ref):
    k = pl.program_id(2)

    @pl.when(k == 0)
    def _():
        acc_ref[...] = jnp.zeros_like(acc_ref)

    acc_ref[...] += jnp.dot(p_ref[...], w_ref[...],
                            preferred_element_type=jnp.float32)

    @pl.when(k == pl.num_programs(2) - 1)
    def _():
        o_ref[...] = (acc_ref[...] + b_ref[...]).astype(o_ref.dtype)


def _pick_tiles(M, K, O, in_bytes, out_bytes, tm_max):
    """Per-generation, weight-aware tile / VMEM budgeting."""
    try:
        vmem_cap = int(pltpu.get_tpu_info().vmem_capacity_bytes)
    except Exception:
        vmem_cap = 64 << 20                      # v7x-safe fallback
    budget = int(vmem_cap * 0.70)                # ~44 MiB v7x, ~89 MiB v5e/v6e

    # --- K (reduction) tiling: bound the MXU panel depth ---
    K_pad = _round_up(K, 128)
    tk_cap = 2048
    num_k = max(1, -(-K_pad // tk_cap))
    tk = _round_up(-(-K_pad // num_k), 128)
    K_pad = tk * num_k

    # --- O tiling: split only when a full-O weight panel would be large ---
    O_pad = _round_up(O, 128)
    tn_cap = 512 if tk * O_pad * in_bytes > (12 << 20) else O_pad
    num_o = max(1, -(-O_pad // tn_cap))
    tn = _round_up(-(-O_pad // num_o), 128)
    O_pad = tn * num_o

    w_resident = (num_k == 1 and num_o == 1)     # constant index_map
    b_resident = (num_o == 1)
    w_bufs = 1 if w_resident else 2
    b_bufs = 1 if b_resident else 2
    weight_bytes = w_bufs * tk * tn * in_bytes
    bias_bytes = b_bufs * tn * 4

    # --- M tiling: spend what is left of the budget on the row tile ---
    per_row = (2 * tk * in_bytes      # double-buffered patch tile
               + 2 * tn * out_bytes   # double-buffered output tile
               + tn * 4)              # f32 accumulator scratch
    headroom = 2 << 20
    rows_budget = budget - weight_bytes - bias_bytes - headroom
    tm = max(128, _round_down(max(rows_budget, 0) // per_row, 128))
    tm = min(tm, int(tm_max), _round_up(M, 128))

    # keep >= 4 parallel grid steps (>= 2 per TensorCore on v7x) so the patch
    # DMA overlaps compute; shrink in 128-row quanta only.
    def _num_m(tm_):
        return _round_up(M, tm_) // tm_

    while tm > 128 and _num_m(tm) * num_o < 4:
        tm = max(128, _round_down(tm // 2, 128))
    M_pad = _round_up(M, tm)

    need = weight_bytes + bias_bytes + tm * per_row + headroom
    vmem_limit = int(min(max(need, 32 << 20), int(vmem_cap * 0.9)))

    return dict(tm=tm, tk=tk, tn=tn, M_pad=M_pad, K_pad=K_pad, O_pad=O_pad,
                num_m=M_pad // tm, num_o=num_o, num_k=num_k,
                w_resident=w_resident, b_resident=b_resident,
                vmem_limit=vmem_limit)


def precompose_orth_weights(weight_V, s, weight_U, bias):
    """Fold s into V and precompose W_eff = V^T diag(s) U^T (exact in eval mode).
    Call once and reuse across forward calls."""
    R, C, kh, kw = weight_V.shape
    O = weight_U.shape[0]
    K = C * kh * kw
    v2 = weight_V.reshape(R, K).astype(jnp.float32)          # (R, K)
    u2 = weight_U.reshape(O, R).astype(jnp.float32)          # (O, R)
    w_eff = (v2.T * s.reshape(1, R).astype(jnp.float32)) @ u2.T   # (K, O)
    if bias is None:
        b_eff = jnp.zeros((O,), jnp.float32)
    else:
        b_eff = bias.reshape(O).astype(jnp.float32)
    return w_eff, b_eff


def conv2d_orth_forward(x, weight_V, s, weight_U, bias,
                        stride=(1, 1), padding=(1, 1),
                        w_eff=None, b_eff=None,
                        tm_max=1024, compute_dtype=jnp.bfloat16,
                        out_layout="NCHW"):
    """Eval-mode forward of Conv2d_Orth.  x is NCHW.  out_layout='NHWC' skips
    the trailing transpose (preferred when the consumer accepts NHWC)."""
    N, C, H, W = x.shape
    kh, kw = weight_V.shape[2], weight_V.shape[3]
    O = weight_U.shape[0]
    sh, sw = stride
    ph, pw = padding
    Hout = (H + 2 * ph - kh) // sh + 1
    Wout = (W + 2 * pw - kw) // sw + 1
    K = C * kh * kw
    M = N * Hout * Wout

    if w_eff is None or b_eff is None:
        w_eff, b_eff = precompose_orth_weights(weight_V, s, weight_U, bias)

    in_bytes = jnp.dtype(compute_dtype).itemsize
    out_bytes = jnp.dtype(x.dtype).itemsize
    t = _pick_tiles(M, K, O, in_bytes, out_bytes, tm_max)
    tm, tk, tn = t["tm"], t["tk"], t["tn"]
    M_pad, K_pad, O_pad = t["M_pad"], t["K_pad"], t["O_pad"]

    # weight / bias prep (tiny, one-time if w_eff/b_eff are cached by caller)
    w_pad = jnp.pad(w_eff, ((0, K_pad - K), (0, O_pad - O))).astype(compute_dtype)
    b_pad = jnp.pad(b_eff.reshape(1, O), ((0, 0), (0, O_pad - O)))   # f32

    # --- im2col (host-side glue); cast before the kh*kw expansion so the big
    #     copy moves compute-dtype (bf16) bytes.  Patch order (C, kh, kw)
    #     matches the OIHW weight flatten used by precompose_orth_weights.
    xp = jnp.pad(x, ((0, 0), (0, 0), (ph, ph), (pw, pw))).astype(compute_dtype)
    cols = [xp[:, :, dh:dh + sh * (Hout - 1) + 1:sh, dw:dw + sw * (Wout - 1) + 1:sw]
            for dh in range(kh) for dw in range(kw)]
    patches = jnp.stack(cols, axis=2)                    # (N, C, kh*kw, Hout, Wout)
    patches = patches.reshape(N, K, Hout, Wout)
    patches = jnp.moveaxis(patches, 1, 3)                # (N, Hout, Wout, K)
    patches = patches.reshape(M, K)
    patches = jnp.pad(patches, ((0, M_pad - M), (0, K_pad - K)))

    num_m, num_o, num_k = t["num_m"], t["num_o"], t["num_k"]

    def run(single_buffer_residents):
        w_kw, b_kw = {}, {}
        if single_buffer_residents:
            if t["w_resident"]:
                w_kw["pipeline_mode"] = pl.Buffered(1)
            if t["b_resident"]:
                b_kw["pipeline_mode"] = pl.Buffered(1)
        in_specs = [
            pl.BlockSpec((tm, tk), lambda i, j, k: (i, k)),           # patch rows
            pl.BlockSpec((tk, tn), lambda i, j, k: (k, j), **w_kw),   # weight panel
            pl.BlockSpec((1, tn), lambda i, j, k: (0, j), **b_kw),    # bias
        ]
        out_specs = pl.BlockSpec((tm, tn), lambda i, j, k: (i, j))
        return pl.pallas_call(
            _orth_matmul_kernel,
            out_shape=jax.ShapeDtypeStruct((M_pad, O_pad), x.dtype),
            grid_spec=pltpu.PrefetchScalarGridSpec(
                num_scalar_prefetch=0,
                grid=(num_m, num_o, num_k),
                in_specs=in_specs,
                out_specs=out_specs,
                scratch_shapes=[pltpu.VMEM((tm, tn), jnp.float32)],
            ),
            compiler_params=pltpu.CompilerParams(
                dimension_semantics=("parallel", "parallel", "arbitrary"),
                vmem_limit_bytes=t["vmem_limit"],
            ),
        )(patches, w_pad, b_pad)

    try:
        out = run(True)
    except Exception:
        # fallback if this jax build rejects single-buffered residents
        out = run(False)

    out = out[:M, :O].reshape(N, Hout, Wout, O)
    if out_layout == "NHWC":
        return out
    return jnp.transpose(out, (0, 3, 1, 2))              # module-native NCHW


def make_orth_params(key, ichnls, ochnls, kh, kw):
    """Build a base conv (PyTorch default init style), SVD-decompose it exactly
    like Conv2d_Orth.__init__, and return decomposed params + original (w, b)."""
    k1, k2 = jax.random.split(key)
    fan_in = ichnls * kh * kw
    bound = 1.0 / math.sqrt(fan_in)
    w = jax.random.uniform(k1, (ochnls, ichnls, kh, kw), jnp.float32, -bound, bound)
    b = jax.random.uniform(k2, (ochnls,), jnp.float32, -bound, bound)

    w2d = np.asarray(w).reshape(ochnls, -1)
    U, s, Vh = np.linalg.svd(w2d, full_matrices=False)    # w2d = U @ diag(s) @ Vh
    R = min(ichnls * kh * kw, ochnls)                     # v_ochnls
    weight_V = jnp.asarray(Vh.reshape(R, ichnls, kh, kw), jnp.float32)
    weight_U = jnp.asarray(U.reshape(ochnls, R, 1, 1), jnp.float32)
    s = jnp.asarray(s, jnp.float32)
    return weight_V, s, weight_U, b, w, b


if __name__ == "__main__":
    key = jax.random.PRNGKey(0)
    kx, kp = jax.random.split(key)

    # small shapes: batch=2, in_channels=4, out_channels=8, 16x16 spatial, 3x3 conv
    N, C, H, W = 2, 4, 16, 16
    O, kh, kw = 8, 3, 3
    stride, padding = (1, 1), (1, 1)

    x = jax.random.normal(kx, (N, C, H, W), jnp.float32)
    weight_V, s, weight_U, bias, w_orig, b_orig = make_orth_params(kp, C, O, kh, kw)

    # reference: the original (un-decomposed) conv, since U diag(s) V^T == W
    ref = lax.conv_general_dilated(
        x, w_orig, window_strides=stride,
        padding=[(padding[0], padding[0]), (padding[1], padding[1])],
        dimension_numbers=("NCHW", "OIHW", "NCHW"),
    ) + b_orig.reshape(1, O, 1, 1)
    ref = jax.block_until_ready(ref)

    # precompose the eval-mode factor once and reuse it across calls
    w_eff, b_eff = precompose_orth_weights(weight_V, s, weight_U, bias)

    # (1) exact f32 compute path, module-native NCHW output, tight tolerance
    out_f32 = conv2d_orth_forward(
        x, weight_V, s, weight_U, bias, stride, padding,
        w_eff=w_eff, b_eff=b_eff,
        compute_dtype=jnp.float32, out_layout="NCHW")
    out_f32 = jax.block_until_ready(out_f32)
    assert out_f32.shape == (N, O, H, W), out_f32.shape
    np.testing.assert_allclose(np.asarray(out_f32), np.asarray(ref),
                               rtol=1e-4, atol=1e-4)

    # (2) default bf16-compute path (f32 accumulation), NHWC output (no
    #     trailing transpose), relaxed tolerance for bf16 rounding
    out_bf16 = conv2d_orth_forward(
        x, weight_V, s, weight_U, bias, stride, padding,
        w_eff=w_eff, b_eff=b_eff, out_layout="NHWC")
    out_bf16 = jax.block_until_ready(out_bf16)
    assert out_bf16.shape == (N, H, W, O), out_bf16.shape
    np.testing.assert_allclose(np.asarray(out_bf16),
                               np.transpose(np.asarray(ref), (0, 2, 3, 1)),
                               rtol=5e-2, atol=5e-2)

    print("KERNEL_OK")
</pallas_src>

<mosaic_0001>
module attributes {stable_mosaic.version = 11 : i64} {
  func.func @_orth_matmul_kernel(%arg0: i32, %arg1: i32, %arg2: i32, %arg3: memref<128x128xf32, #tpu.memory_space<vmem>>, %arg4: memref<128x128xf32, #tpu.memory_space<vmem>>, %arg5: memref<1x128xf32, #tpu.memory_space<vmem>>, %arg6: memref<128x128xf32, #tpu.memory_space<vmem>>, %arg7: memref<128x128xf32, #tpu.memory_space<vmem>>) attributes {dimension_semantics = [#tpu.dimension_semantics<parallel>, #tpu.dimension_semantics<parallel>, #tpu.dimension_semantics<arbitrary>], iteration_bounds = array<i64: 4, 1, 1>, scalar_prefetch = 0 : i64, scratch_operands = 1 : i64, tpu.core_type = #tpu.core_type<tc>, window_params = [{transform_indices = @transform_0, window_bounds = array<i64: 128, 128>}, {pipeline_mode = #tpu.pipeline_mode<synchronous>, transform_indices = @transform_1, window_bounds = array<i64: 128, 128>}, {pipeline_mode = #tpu.pipeline_mode<synchronous>, transform_indices = @transform_2, window_bounds = array<i64: 1, 128>}, {transform_indices = @transform_3, window_bounds = array<i64: 128, 128>}]} {
    %c0_i32 = arith.constant 0 : i32
    %0 = arith.cmpi eq, %arg2, %c0_i32 : i32
    %1 = arith.extui %0 : i1 to i32
    %c0_i32_0 = arith.constant 0 : i32
    %2 = arith.cmpi ne, %1, %c0_i32_0 : i32
    scf.if %2 {
      %cst_10 = arith.constant 0.000000e+00 : f32
      %12 = vector.broadcast %cst_10 : f32 to vector<128x128xf32>
      %c0_11 = arith.constant 0 : index
      %c0_12 = arith.constant 0 : index
      %13 = vector.load %arg7[%c0_11, %c0_12] : memref<128x128xf32, #tpu.memory_space<vmem>>, vector<128x128xf32>
      tpu.vector_store %arg7[%c0_11, %c0_12], %12 {strides = array<i32>} : memref<128x128xf32, #tpu.memory_space<vmem>>, vector<128x128xf32>,
    } else {
    }
    %c0 = arith.constant 0 : index
    %c0_1 = arith.constant 0 : index
    %3 = vector.load %arg7[%c0, %c0_1] : memref<128x128xf32, #tpu.memory_space<vmem>>, vector<128x128xf32>
    %c0_2 = arith.constant 0 : index
    %c0_3 = arith.constant 0 : index
    %4 = vector.load %arg3[%c0_2, %c0_3] : memref<128x128xf32, #tpu.memory_space<vmem>>, vector<128x128xf32>
    %c0_4 = arith.constant 0 : index
    %c0_5 = arith.constant 0 : index
    %5 = vector.load %arg4[%c0_4, %c0_5] : memref<128x128xf32, #tpu.memory_space<vmem>>, vector<128x128xf32>
    %cst = arith.constant dense<0.000000e+00> : vector<128x128xf32>
    %6 = tpu.matmul %4, %5, %cst {dimension_numbers = #tpu.dot_dimension_numbers<[1], [0], [0], [1], [0, 0, 1, 1], [], []>} : vector<128x128xf32>, vector<128x128xf32>, vector<128x128xf32> -> vector<128x128xf32>
    %7 = arith.addf %3, %6 : vector<128x128xf32>
    %c0_6 = arith.constant 0 : index
    %c0_7 = arith.constant 0 : index
    %8 = vector.load %arg7[%c0_6, %c0_7] : memref<128x128xf32, #tpu.memory_space<vmem>>, vector<128x128xf32>
    tpu.vector_store %arg7[%c0_6, %c0_7], %7 {strides = array<i32>} : memref<128x128xf32, #tpu.memory_space<vmem>>, vector<128x128xf32>,
    %c0_i32_8 = arith.constant 0 : i32
    %9 = arith.cmpi eq, %arg2, %c0_i32_8 : i32
    %10 = arith.extui %9 : i1 to i32
    %c0_i32_9 = arith.constant 0 : i32
    %11 = arith.cmpi ne, %10, %c0_i32_9 : i32
    scf.if %11 {
      %c0_10 = arith.constant 0 : index
      %c0_11 = arith.constant 0 : index
      %12 = vector.load %arg7[%c0_10, %c0_11] : memref<128x128xf32, #tpu.memory_space<vmem>>, vector<128x128xf32>
      %c0_12 = arith.constant 0 : index
      %c0_13 = arith.constant 0 : index
      %13 = vector.load %arg5[%c0_12, %c0_13] : memref<1x128xf32, #tpu.memory_space<vmem>>, vector<1x128xf32>
      %14 = vector.broadcast %13 : vector<1x128xf32> to vector<128x128xf32>
      %15 = arith.addf %12, %14 : vector<128x128xf32>
      %c0_14 = arith.constant 0 : index
      %c0_15 = arith.constant 0 : index
      %16 = vector.load %arg6[%c0_14, %c0_15] : memref<128x128xf32, #tpu.memory_space<vmem>>, vector<128x128xf32>
      tpu.vector_store %arg6[%c0_14, %c0_15], %15 {strides = array<i32>} : memref<128x128xf32, #tpu.memory_space<vmem>>, vector<128x128xf32>,
    } else {
    }
    return
  }
  func.func @transform_0(%arg0: i32, %arg1: i32, %arg2: i32) -> (i32, i32) {
    %c0_i32 = arith.constant 0 : i32
    return %arg0, %arg2 : i32, i32
  }
  func.func @transform_1(%arg0: i32, %arg1: i32, %arg2: i32) -> (i32, i32) {
    %c0_i32 = arith.constant 0 : i32
    return %arg2, %arg1 : i32, i32
  }
  func.func @transform_2(%arg0: i32, %arg1: i32, %arg2: i32) -> (i32, i32) {
    %c0_i32 = arith.constant 0 : i32
    %c0_i32_0 = arith.constant 0 : i32
    return %c0_i32, %arg1 : i32, i32
  }
  func.func @transform_3(%arg0: i32, %arg1: i32, %arg2: i32) -> (i32, i32) {
    %c0_i32 = arith.constant 0 : i32
    return %arg0, %arg1 : i32, i32
  }
}

module attributes {stable_mosaic.version = 11 : i64} {
  func.func @_orth_matmul_kernel(%arg0: i32, %arg1: i32, %arg2: i32, %arg3: memref<128x128xf32, #tpu.memory_space<vmem>>, %arg4: memref<128x128xf32, #tpu.memory_space<vmem>>, %arg5: memref<1x128xf32, #tpu.memory_space<vmem>>, %arg6: memref<128x128xf32, #tpu.memory_space<vmem>>, %arg7: memref<128x128xf32, #tpu.memory_space<vmem>>) attributes {dimension_semantics = [#tpu.dimension_semantics<parallel>, #tpu.dimension_semantics<parallel>, #tpu.dimension_semantics<arbitrary>], iteration_bounds = array<i64: 4, 1, 1>, scalar_prefetch = 0 : i64, scratch_operands = 1 : i64, tpu.core_type = #tpu.core_type<tc>, window_params = [{transform_indices = @transform_0, window_bounds = array<i64: 128, 128>}, {transform_indices = @transform_1, window_bounds = array<i64: 128, 128>}, {transform_indices = @transform_2, window_bounds = array<i64: 1, 128>}, {transform_indices = @transform_3, window_bounds = array<i64: 128, 128>}]} {
    %c0_i32 = arith.constant 0 : i32
    %0 = arith.cmpi eq, %arg2, %c0_i32 : i32
    %1 = arith.extui %0 : i1 to i32
    %c0_i32_0 = arith.constant 0 : i32
    %2 = arith.cmpi ne, %1, %c0_i32_0 : i32
    scf.if %2 {
      %cst_10 = arith.constant 0.000000e+00 : f32
      %12 = vector.broadcast %cst_10 : f32 to vector<128x128xf32>
      %c0_11 = arith.constant 0 : index
      %c0_12 = arith.constant 0 : index
      %13 = vector.load %arg7[%c0_11, %c0_12] : memref<128x128xf32, #tpu.memory_space<vmem>>, vector<128x128xf32>
      tpu.vector_store %arg7[%c0_11, %c0_12], %12 {strides = array<i32>} : memref<128x128xf32, #tpu.memory_space<vmem>>, vector<128x128xf32>,
    } else {
    }
    %c0 = arith.constant 0 : index
    %c0_1 = arith.constant 0 : index
    %3 = vector.load %arg7[%c0, %c0_1] : memref<128x128xf32, #tpu.memory_space<vmem>>, vector<128x128xf32>
    %c0_2 = arith.constant 0 : index
    %c0_3 = arith.constant 0 : index
    %4 = vector.load %arg3[%c0_2, %c0_3] : memref<128x128xf32, #tpu.memory_space<vmem>>, vector<128x128xf32>
    %c0_4 = arith.constant 0 : index
    %c0_5 = arith.constant 0 : index
    %5 = vector.load %arg4[%c0_4, %c0_5] : memref<128x128xf32, #tpu.memory_space<vmem>>, vector<128x128xf32>
    %cst = arith.constant dense<0.000000e+00> : vector<128x128xf32>
    %6 = tpu.matmul %4, %5, %cst {dimension_numbers = #tpu.dot_dimension_numbers<[1], [0], [0], [1], [0, 0, 1, 1], [], []>} : vector<128x128xf32>, vector<128x128xf32>, vector<128x128xf32> -> vector<128x128xf32>
    %7 = arith.addf %3, %6 : vector<128x128xf32>
    %c0_6 = arith.constant 0 : index
    %c0_7 = arith.constant 0 : index
    %8 = vector.load %arg7[%c0_6, %c0_7] : memref<128x128xf32, #tpu.memory_space<vmem>>, vector<128x128xf32>
    tpu.vector_store %arg7[%c0_6, %c0_7], %7 {strides = array<i32>} : memref<128x128xf32, #tpu.memory_space<vmem>>, vector<128x128xf32>,
    %c0_i32_8 = arith.constant 0 : i32
    %9 = arith.cmpi eq, %arg2, %c0_i32_8 : i32
    %10 = arith.extui %9 : i1 to i32
    %c0_i32_9 = arith.constant 0 : i32
    %11 = arith.cmpi ne, %10, %c0_i32_9 : i32
    scf.if %11 {
      %c0_10 = arith.constant 0 : index
      %c0_11 = arith.constant 0 : index
      %12 = vector.load %arg7[%c0_10, %c0_11] : memref<128x128xf32, #tpu.memory_space<vmem>>, vector<128x128xf32>
      %c0_12 = arith.constant 0 : index
      %c0_13 = arith.constant 0 : index
      %13 = vector.load %arg5[%c0_12, %c0_13] : memref<1x128xf32, #tpu.memory_space<vmem>>, vector<1x128xf32>
      %14 = vector.broadcast %13 : vector<1x128xf32> to vector<128x128xf32>
      %15 = arith.addf %12, %14 : vector<128x128xf32>
      %c0_14 = arith.constant 0 : index
      %c0_15 = arith.constant 0 : index
      %16 = vector.load %arg6[%c0_14, %c0_15] : memref<128x128xf32, #tpu.memory_space<vmem>>, vector<128x128xf32>
      tpu.vector_store %arg6[%c0_14, %c0_15], %15 {strides = array<i32>} : memref<128x128xf32, #tpu.memory_space<vmem>>, vector<128x128xf32>,
    } else {
    }
    return
  }
  func.func @transform_0(%arg0: i32, %arg1: i32, %arg2: i32) -> (i32, i32) {
    %c0_i32 = arith.constant 0 : i32
    return %arg0, %arg2 : i32, i32
  }
  func.func @transform_1(%arg0: i32, %arg1: i32, %arg2: i32) -> (i32, i32) {
    %c0_i32 = arith.constant 0 : i32
    return %arg2, %arg1 : i32, i32
  }
  func.func @transform_2(%arg0: i32, %arg1: i32, %arg2: i32) -> (i32, i32) {
    %c0_i32 = arith.constant 0 : i32
    %c0_i32_0 = arith.constant 0 : i32
    return %c0_i32, %arg1 : i32, i32
  }
  func.func @transform_3(%arg0: i32, %arg1: i32, %arg2: i32) -> (i32, i32) {
    %c0_i32 = arith.constant 0 : i32
    return %arg0, %arg1 : i32, i32
  }
}

</mosaic_0001>

<bundles_post_ra>
// kernel: tpu_custom_call.1
= control target key start
LH: loop header
LB: loop body
LE: loop exit
PB: predicated region body
PF: predicated region fallthrough
CT: control target
= control target key end

     0   :  { %8 = vsyncpa [#allocation4], 0  ;;  %s1302_s0 = inlined_call_operand.hbm [shape: f32[512,128], index: 0, kind: input, shape index: {}]   ;;  %s1303_s1 = inlined_call_operand.hbm [shape: f32[128,128], index: 1, kind: input, shape index: {}]   ;;  %s1304_s2 = inlined_call_operand.vmem [shape: f32[1,128], index: 2, kind: input, shape index: {}]   ;;  %s1305_s3 = inlined_call_operand.hbm [shape: f32[512,128], index: 3, kind: output, shape index: {}]  }
   0x1   :  { %10 = vsyncpa [#allocation4 + $0x1], 0 }
   0x2   :  { %11 = vsyncpa [#allocation7], 0 }
   0x3   :  { %12 = vsyncpa [#allocation5], 0 }
   0x4   :  { %14 = vsyncpa [#allocation5 + $0x1], 0  ;;  %s1073_s12 = smov 0   ;;  %s1075_s13 = smov 0  }
   0x5   :  { %s1077_s14 = smov 0   ;;  %s1079_s15 = smov 0  }
   0x6   :  { %s1081_s16 = smov 0   ;;  %s1083_s17 = smov 0  }
   0x7 LB: > { %s688_s18 = sadd.s32 4294967295, %s1044_s17   ;;  %s689_s19 = sadd.s32 4294967294, %s1044_s17   ;;  %s1044_s17 = sphi %s1083_s17, %s20_s17   ;;  %s1040_s16 = sphi %s1081_s16, %s1326_s16   ;;  %s1036_s15 = sphi %s1079_s15, %s1325_s15   ;;  %s1032_s14 = sphi %s1077_s14, %s1324_s14   ;;  %s1028_s13 = sphi %s1075_s13, %s1323_s13   ;;  %s1024_s12 = sphi %s1073_s12, %s1322_s12  }
   0x8   : > { %p61_p0 = scmp.ne.s32.totalorder %s1028_s13, %s1024_s12  ;;  %p1107_p1 = scmp.eq.s32.totalorder %s688_s18, 0 }
   0x9   : > { %p1111_p2 = scmp.eq.s32.totalorder %s688_s18, 3  ;;  %p147_p3 = scmp.eq.s32.totalorder %s689_s19, 3 }
   0xa   : > { %p1117_p4 = por %p1107_p1, %p61_p0  ;;  %p690_p5 = scmp.ge.s32.totalorder %s1044_s17, 1 }
   0xb   : > { %p1122_p6 = por %p147_p3, %p61_p0  ;;  %p154_p7 = scmp.lt.s32.totalorder %s1044_s17, 5 }
   0xc   : > { %s1046_s25 = smov [#allocation6]   ;;  %s39_s28 = sadd.s32 1, %s1040_s16 }
   0xd   : > { %s1312_s23 = scalar_select %p1122_p6, 1, 0 }
   0xe   : > { %p1127_p8 = pnand %p690_p5, %p154_p7  ;;  %s170_s26 = sshll.u32 %s1046_s25, 4  ;;  %s171_s26 = int_to_ptr.vmem [resolvable:$true] %s170_s26 }
   0xf   : > { %s917_s29 = scalar_lea.vmem %s171_s26, 2048  ;;  %p925_p3 = scmp.lt.s32.totalorder %s171_s26, %s171_s26 }
  0x10   : > { %p837_p9 = pneg %p1127_p8  ;;  %p918_p12 = scmp.ne.s32.totalorder %s171_s26, %s917_s29 }
  0x11   : > { %p926_p5 = scmp.lt.s32.totalorder %s917_s29, %s917_s29 }
  0x12   : > { %p1135_p10 = pnand %p837_p9, %p1107_p1 }
  0x13   : > { %p927_p7 = por %p926_p5, %p925_p3 }
  0x14   : > { %p908_p11 = pneg %p1135_p10 }
  0x16   : > { %p920_p13 = pnand %p918_p12, %p908_p11 }
  0x18   : > { %p921_p0 = pneg %p920_p13 }
  0x1a   : > { %p928_p6 = pnand %p927_p7, %p921_p0 }
  0x1c   : > { %931 = shalt.err (!%p928_p6)
}
  0x1d   : > { %s1306_s30 = smov 128   ;;  %s1307_s4 = smov 8  }
  0x1e   : > { %840 = dma.hbm_to_vmem [thread:$0]  (!%p1135_p10), %s1303_s1, 2048, %s171_s26, [#allocation7], %s1306_s30, %s1306_s30, %s1307_s4  }
  0x1f   : > { %p41_p6 = scmp.ge.s32.totalorder %s39_s28, 4  ;;  %s48_s7 = sadd.s32 1, %s1032_s14 }
  0x20   : > { %p55_p9 = scmp.ne.s32.totalorder %s1032_s14, %s1028_s13  ;;  %p56_p11 = scmp.eq.s32.totalorder %s1044_s17, 0 }
  0x21   : > { %s1328_s28 = smov (%p41_p6, %s39_s28), 0  ;;  %p850_p0 = scmp.lt.s32.totalorder %s1044_s17, 4 }
  0x22   : > { %p1156_p12 = por %p56_p11, %p55_p9  ;;  %p1162_p13 = por %p1111_p2, %p55_p9 }
  0x23   : > { %s43_s10 = ssub.s32 %s1040_s16, %s1328_s28  ;;  %s190_s11 = sand.u32 1, %s1032_s14  }
  0x24   : > { %s1316_s9 = scalar_select %p1162_p13, 1, 0 }
  0x25   : > { %p46_p10 = scmp.eq.s32.totalorder %s43_s10, 0  ;;  %s694_s18 = sshll.u32 %s190_s11, 7 }
  0x26   : > { %s707_s25 = sshll.u32 %s1040_s16, 11  ;;  %s194_s5 = scalar_lea.vmem [#allocation3], %s694_s18 }
  0x27   : > { %s1171_s19 = scalar_select %p46_p10, %s1032_s14, %s48_s7  }
  0x28   : > { %s201_s29 = scalar_lea.hbm %s1302_s0, %s707_s25  ;;  %s202_s6 = sshll.u32 %s194_s5, 4  ;;  %s203_s6 = int_to_ptr.vmem [resolvable:$true] %s202_s6 }
  0x29   : > { %p1179_p2 = pnand %p850_p0, %p1156_p12  ;;  %s191_s30 = scalar_lea.sflag [#allocation4], %s190_s11 }
  0x2a   : > { %s945_s10 = scalar_lea.vmem %s203_s6, 2048  ;;  %s1049_s7 = smov [#allocation3]  }
  0x2b   : > { %p934_p3 = pneg %p1179_p2  ;;  %p946_p5 = scmp.ne.s32.totalorder %s203_s6, %s945_s10 }
  0x2c   : > { %s950_s4 = sshll.u32 %s1049_s7, 4  ;;  %s951_s4 = int_to_ptr.vmem [resolvable:$false] %s950_s4 }
  0x2d   : > { %p948_p7 = pnand %p946_p5, %p934_p3  ;;  %s952_s25 = scalar_lea.vmem %s951_s4, 4096 }
  0x2e   : > { %p953_p9 = scmp.lt.s32.totalorder %s203_s6, %s951_s4  ;;  %p954_p11 = scmp.lt.s32.totalorder %s952_s25, %s945_s10 }
  0x2f   : > { %p949_p6 = pneg %p948_p7 }
  0x30   : > { %p955_p10 = por %p954_p11, %p953_p9 }
  0x32   : > { %p956_p13 = pnand %p955_p10, %p949_p6 }
  0x34   : > { %959 = shalt.err (!%p956_p13)
}
  0x35   : > { %s1318_s8 = smov 8   ;;  %s1319_s18 = smov 128  }
  0x36   : > { %844 = dma.hbm_to_vmem [thread:$0]  (!%p1179_p2), %s201_s29, 2048, %s203_s6, %s191_s30, %s1319_s18, %s1319_s18, %s1318_s8  }
  0x37   : > { %214 = sbr.rel (%p1127_p8) target bundleno = 320 (0x140), region = 32  ;;  %s1193_s11 = sand.u32 (!%p1127_p8), 1, %s1028_s13  }
  0x38   : > { %s698_s4 = sshll.u32 (!%p1127_p8), %s1193_s11, 7  ;;  %s217_s26 = scalar_lea.sflag (!%p1127_p8), [#allocation4], %s1193_s11 }
  0x39   : > { %s1199_s27 = scalar_lea.vmem (!%p1127_p8), [#allocation3], %s698_s4 }
  0x3c   : > { %1011 = dma.done.wait (%p1117_p4), %s217_s26, 2048  }
  0x3d   : > { %1013 = vsyncadd (%p1117_p4), %s217_s26, 4294965248 }
  0x3e   : > { %1015 = dma.done.wait (%p1107_p1), [#allocation7], 2048  }
  0x3f   : > { %1017 = vsyncadd (%p1107_p1), [#allocation7], 4294965248  ;;  %v323_v0 = vld [vmem:[#allocation6 + $0x78] sm:$0xff]  ;;  %v322_v1 = vld [vmem:[#allocation6 + $0x70] sm:$0xff]  ;;  %s1230_s24 = scalar_lea.vmem [#allocation8], %s698_s4  ;;  %s708_s30 = sshll.u32 %s1036_s15, 11 }
  0x40   : > { %741 = vmatprep.subr.mxu0 %v323_v0  ;;  %797 = vmatprep.subr.mxu1 %v323_v0  ;;  %v321_v2 = vld [vmem:[#allocation6 + $0x68] sm:$0xff]  ;;  %v320_v3 = vld [vmem:[#allocation6 + $0x60] sm:$0xff]  ;;  %v319_v4 = vld [vmem:[#allocation6 + $0x58] sm:$0xff]  ;;  %s574_s29 = sshll.u32 %s1230_s24, 4  ;;  %s1249_s21 = scalar_lea.hbm %s1305_s3, %s708_s30  ;;  %s1251_s29 = int_to_ptr.vmem [resolvable:$true] %s574_s29 }
  0x41   : > { %742 = vmatpush3.msra.mxu0 %v323_v0  ;;  %813 = vmatpush3.msra.mxu1 %v323_v0  ;;  %v318_v5 = vld [vmem:[#allocation6 + $0x50] sm:$0xff]  ;;  %v317_v6 = vld [vmem:[#allocation6 + $0x48] sm:$0xff]  ;;  %v316_v7 = vld [vmem:[#allocation6 + $0x40] sm:$0xff]  ;;  %s560_s15 = scalar_lea.sflag [#allocation5], %s1193_s11  ;;  %s960_s10 = scalar_lea.vmem %s1251_s29, 2048 }
  0x42   : > { %743 = vmatprep.subr.mxu0 %v322_v1  ;;  %798 = vmatprep.subr.mxu1 %v322_v1  ;;  %v315_v8 = vld [vmem:[#allocation6 + $0x38] sm:$0xff]  ;;  %v314_v9 = vld [vmem:[#allocation6 + $0x30] sm:$0xff]  ;;  %v313_v10 = vld [vmem:[#allocation6 + $0x28] sm:$0xff]  ;;  %p961_p1 = scmp.ne.s32.totalorder %s1251_s29, %s960_s10  ;;  %p1320_p4 = scmp.ne.s32.totalorder %s1316_s9, 0 }
  0x43   : > { %744 = vmatpush3.msra.mxu0 %v322_v1  ;;  %814 = vmatpush3.msra.mxu1 %v322_v1  ;;  %v312_v11 = vld [vmem:[#allocation6 + $0x20] sm:$0xff]  ;;  %v311_v12 = vld [vmem:[#allocation6 + $0x18] sm:$0xff]  ;;  %v310_v13 = vld [vmem:[#allocation6 + $0x10] sm:$0xff]  ;;  %s1050_s7 = smov [#allocation8]  }
  0x44   : > { %745 = vmatprep.subr.mxu0 %v321_v2  ;;  %799 = vmatprep.subr.mxu1 %v321_v2  ;;  %v309_v14 = vld [vmem:[#allocation6 + $0x8] sm:$0xff]  ;;  %v308_v15 = vld [vmem:[#allocation6] sm:$0xff]  ;;  %v294_v20 = vld [vmem:[%s1199_s27 + $0x10] sm:$0xff]  ;;  %p962_p8 = pnand %p961_p1, %p1320_p4  ;;  %s964_s25 = sshll.u32 %s1050_s7, 4  ;;  %s965_s25 = int_to_ptr.vmem [resolvable:$false] %s964_s25 }
  0x45   : > { %746 = vmatpush3.msra.mxu0 %v321_v2  ;;  %815 = vmatpush3.msra.mxu1 %v321_v2  ;;  %v292_v16 = vld [vmem:[%s1199_s27] sm:$0xff]  ;;  %v293_v18 = vld [vmem:[%s1199_s27 + $0x8] sm:$0xff]  ;;  %v302_v21 = vld [vmem:[%s1199_s27 + $0x50] sm:$0xff]  ;;  %s966_s8 = scalar_lea.vmem %s965_s25, 4096  ;;  %p967_p13 = scmp.lt.s32.totalorder %s1251_s29, %s965_s25 }
  0x46   : > { %747 = vmatprep.subr.mxu0 %v320_v3  ;;  %800 = vmatprep.subr.mxu1 %v320_v3  ;;  %v300_v17 = vld [vmem:[%s1199_s27 + $0x40] sm:$0xff]  ;;  %v301_v19 = vld [vmem:[%s1199_s27 + $0x48] sm:$0xff]  ;;  %v295_v22 = vld [vmem:[%s1199_s27 + $0x18] sm:$0xff]  ;;  %p963_p12 = pneg %p962_p8  ;;  %p968_p0 = scmp.lt.s32.totalorder %s966_s8, %s960_s10 }
  0x47   : > { %748 = vmatpush3.msra.mxu0 %v320_v3  ;;  %816 = vmatpush3.msra.mxu1 %v320_v3  ;;  %v303_v23 = vld [vmem:[%s1199_s27 + $0x58] sm:$0xff]  ;;  %v296_v24 = vld [vmem:[%s1199_s27 + $0x20] sm:$0xff]  ;;  %v297_v26 = vld [vmem:[%s1199_s27 + $0x28] sm:$0xff] }
  0x48   : > { %749 = vmatprep.subr.mxu0 %v319_v4  ;;  %801 = vmatprep.subr.mxu1 %v319_v4  ;;  %v304_v25 = vld [vmem:[%s1199_s27 + $0x60] sm:$0xff]  ;;  %v305_v27 = vld [vmem:[%s1199_s27 + $0x68] sm:$0xff]  ;;  %v298_v28 = vld [vmem:[%s1199_s27 + $0x30] sm:$0xff]  ;;  %p969_p2 = por %p968_p0, %p967_p13 }
  0x49   : > { %750 = vmatpush3.msra.mxu0 %v319_v4  ;;  %817 = vmatpush3.msra.mxu1 %v319_v4  ;;  %v306_v29 = vld [vmem:[%s1199_s27 + $0x70] sm:$0xff]  ;;  %v299_v30 = vld [vmem:[%s1199_s27 + $0x38] sm:$0xff]  ;;  %v701_v32 = vld [vmem:[%s1304_s2] ss:$0 sm:$0xff] }
  0x4a   : > { %751 = vmatprep.subr.mxu0 %v318_v5  ;;  %802 = vmatprep.subr.mxu1 %v318_v5  ;;  %v307_v31 = vld [vmem:[%s1199_s27 + $0x78] sm:$0xff]  ;;  %p970_p3 = pnand %p969_p2, %p963_p12 }
  0x4b   : > { %752 = vmatpush3.msra.mxu0 %v318_v5  ;;  %818 = vmatpush3.msra.mxu1 %v318_v5 }
  0x4c   : > { %753 = vmatprep.subr.mxu0 %v317_v6  ;;  %803 = vmatprep.subr.mxu1 %v317_v6 }
  0x4d   : > { %754 = vmatpush3.msra.mxu0 %v317_v6  ;;  %819 = vmatpush3.msra.mxu1 %v317_v6 }
  0x4e   : > { %755 = vmatprep.subr.mxu0 %v316_v7  ;;  %804 = vmatprep.subr.mxu1 %v316_v7 }
  0x4f   : > { %756 = vmatpush3.msra.mxu0 %v316_v7  ;;  %820 = vmatpush3.msra.mxu1 %v316_v7 }
  0x50   : > { %757 = vmatprep.subr.mxu0 %v315_v8  ;;  %805 = vmatprep.subr.mxu1 %v315_v8 }
  0x51   : > { %758 = vmatpush3.msra.mxu0 %v315_v8  ;;  %821 = vmatpush3.msra.mxu1 %v315_v8 }
  0x52   : > { %759 = vmatprep.subr.mxu0 %v314_v9  ;;  %806 = vmatprep.subr.mxu1 %v314_v9 }
  0x53   : > { %760 = vmatpush3.msra.mxu0 %v314_v9  ;;  %822 = vmatpush3.msra.mxu1 %v314_v9 }
  0x54   : > { %761 = vmatprep.subr.mxu0 %v313_v10  ;;  %807 = vmatprep.subr.mxu1 %v313_v10 }
  0x55   : > { %762 = vmatpush3.msra.mxu0 %v313_v10  ;;  %823 = vmatpush3.msra.mxu1 %v313_v10 }
  0x56   : > { %763 = vmatprep.subr.mxu0 %v312_v11  ;;  %808 = vmatprep.subr.mxu1 %v312_v11 }
  0x57   : > { %764 = vmatpush3.msra.mxu0 %v312_v11  ;;  %824 = vmatpush3.msra.mxu1 %v312_v11 }
  0x58   : > { %765 = vmatprep.subr.mxu0 %v311_v12  ;;  %809 = vmatprep.subr.mxu1 %v311_v12 }
  0x59   : > { %766 = vmatpush3.msra.mxu0 %v311_v12  ;;  %825 = vmatpush3.msra.mxu1 %v311_v12 }
  0x5a   : > { %767 = vmatprep.subr.mxu0 %v310_v13  ;;  %810 = vmatprep.subr.mxu1 %v310_v13 }
  0x5b   : > { %768 = vmatpush3.msra.mxu0 %v310_v13  ;;  %826 = vmatpush3.msra.mxu1 %v310_v13 }
  0x5c   : > { %769 = vmatprep.subr.mxu0 %v309_v14  ;;  %811 = vmatprep.subr.mxu1 %v309_v14 }
  0x5d   : > { %770 = vmatpush3.msra.mxu0 %v309_v14  ;;  %827 = vmatpush3.msra.mxu1 %v309_v14 }
  0x5e   : > { %771 = vmatprep.subr.mxu0 %v308_v15  ;;  %812 = vmatprep.subr.mxu1 %v308_v15 }
  0x5f   : > { %772 = vmatpush3.msra.mxu0 %v308_v15  ;;  %828 = vmatpush3.msra.mxu1 %v308_v15 }
  0x60   : > { %773 = vmatprep.mubr.f32.mxu0 %v292_v16  ;;  %785 = vmatprep.mubr.f32.mxu1 %v300_v17 }
  0x61   : > { %774 = vmatmul.mubr.f32.vlgmr.msra.gmra.mxu0 %v293_v18  ;;  %786 = vmatmul.mubr.f32.vlgmr.msra.gmra.mxu1 %v301_v19 }
  0x62   : > { %776 = vmatprep.mubr.f32.mxu0 %v294_v20  ;;  %788 = vmatprep.mubr.f32.mxu1 %v302_v21 }
  0x65   : > { %777 = vmatmul.mubr.f32.gmra.mxu0 %v295_v22  ;;  %789 = vmatmul.mubr.f32.gmra.mxu1 %v303_v23 }
  0x66   : > { %779 = vmatprep.mubr.f32.mxu0 %v296_v24  ;;  %791 = vmatprep.mubr.f32.mxu1 %v304_v25 }
  0x69   : > { %780 = vmatmul.mubr.f32.gmra.mxu0 %v297_v26  ;;  %792 = vmatmul.mubr.f32.gmra.mxu1 %v305_v27 }
  0x6a   : > { %782 = vmatprep.mubr.f32.mxu0 %v298_v28  ;;  %794 = vmatprep.mubr.f32.mxu1 %v306_v29 }
  0x6d   : > { %783 = vmatmul.mubr.f32.gmra.mxu0 %v299_v30  ;;  %795 = vmatmul.mubr.f32.gmra.mxu1 %v307_v31 }
 0x121   : > { %v775_v33 = vpop.f32.mrf.mxu0  ;;  %v787_v34 = vpop.f32.mrf.mxu1 }
 0x122   : > { %v528_v35 = vadd.f32 %v775_v33, %v701_v32  ;;  %v536_v36 = vadd.f32 %v787_v34, %v701_v32 }
 0x123   : > { %v390_v37 = vpop.f32.mrf.mxu0  ;;  %v430_v38 = vpop.f32.mrf.mxu1 }
 0x124   : > { %544 = vst [vmem:[%s1230_s24 + $0x8] sm:$0xff] %v528_v35  ;;  %552 = vst [vmem:[%s1230_s24 + $0x48] sm:$0xff] %v536_v36  ;;  %v527_v39 = vadd.f32 %v701_v32, %v390_v37  ;;  %v535_v40 = vadd.f32 %v701_v32, %v430_v38 }
 0x125   : > { %v778_v41 = vpop.f32.mrf.mxu0  ;;  %v790_v42 = vpop.f32.mrf.mxu1 }
 0x126   : > { %543 = vst [vmem:[%s1230_s24] sm:$0xff] %v527_v39  ;;  %551 = vst [vmem:[%s1230_s24 + $0x40] sm:$0xff] %v535_v40  ;;  %v530_v43 = vadd.f32 %v778_v41, %v701_v32  ;;  %v538_v44 = vadd.f32 %v790_v42, %v701_v32 }
 0x127   : > { %v400_v45 = vpop.f32.mrf.mxu0  ;;  %v440_v46 = vpop.f32.mrf.mxu1 }
 0x128   : > { %546 = vst [vmem:[%s1230_s24 + $0x18] sm:$0xff] %v530_v43  ;;  %554 = vst [vmem:[%s1230_s24 + $0x58] sm:$0xff] %v538_v44  ;;  %v529_v47 = vadd.f32 %v701_v32, %v400_v45  ;;  %v537_v48 = vadd.f32 %v701_v32, %v440_v46 }
 0x129   : > { %v781_v49 = vpop.f32.mrf.mxu0  ;;  %v793_v50 = vpop.f32.mrf.mxu1 }
 0x12a   : > { %545 = vst [vmem:[%s1230_s24 + $0x10] sm:$0xff] %v529_v47  ;;  %553 = vst [vmem:[%s1230_s24 + $0x50] sm:$0xff] %v537_v48  ;;  %v532_v51 = vadd.f32 %v781_v49, %v701_v32  ;;  %v540_v52 = vadd.f32 %v793_v50, %v701_v32 }
 0x12b   : > { %v410_v53 = vpop.f32.mrf.mxu0  ;;  %v450_v54 = vpop.f32.mrf.mxu1 }
 0x12c   : > { %548 = vst [vmem:[%s1230_s24 + $0x28] sm:$0xff] %v532_v51  ;;  %556 = vst [vmem:[%s1230_s24 + $0x68] sm:$0xff] %v540_v52  ;;  %v531_v55 = vadd.f32 %v701_v32, %v410_v53  ;;  %v539_v56 = vadd.f32 %v701_v32, %v450_v54 }
 0x12d   : > { %v784_v57 = vpop.f32.mrf.mxu0  ;;  %v796_v58 = vpop.f32.mrf.mxu1 }
 0x12e   : > { %547 = vst [vmem:[%s1230_s24 + $0x20] sm:$0xff] %v531_v55  ;;  %555 = vst [vmem:[%s1230_s24 + $0x60] sm:$0xff] %v539_v56  ;;  %v534_v59 = vadd.f32 %v784_v57, %v701_v32  ;;  %v542_v60 = vadd.f32 %v796_v58, %v701_v32 }
 0x12f   : > { %v420_v61 = vpop.f32.mrf.mxu0  ;;  %v460_v62 = vpop.f32.mrf.mxu1 }
 0x130   : > { %550 = vst [vmem:[%s1230_s24 + $0x38] sm:$0xff] %v534_v59  ;;  %558 = vst [vmem:[%s1230_s24 + $0x78] sm:$0xff] %v542_v60  ;;  %v533_v63 = vadd.f32 %v701_v32, %v420_v61  ;;  %v541_v0 = vadd.f32 %v701_v32, %v460_v62 }
 0x132   : > { %549 = vst [vmem:[%s1230_s24 + $0x30] sm:$0xff] %v533_v63  ;;  %557 = vst [vmem:[%s1230_s24 + $0x70] sm:$0xff] %v541_v0 }
 0x133   : > { %973 = shalt.err (!%p970_p3)
}
 0x134   : > { %s974_s18 = scalar_lea.hbm %s1249_s21, 2048  ;;  %s978_s27 = scalar_lea.hbm %s1305_s3, 8192 }
 0x135   : > { %p975_p5 = scmp.ne.s32.totalorder %s1249_s21, %s974_s18  ;;  %p979_p9 = scmp.lt.s32.totalorder %s1249_s21, %s1305_s3 }
 0x136   : > { %p980_p11 = scmp.lt.s32.totalorder %s978_s27, %s974_s18 }
 0x137   : > { %p976_p7 = pnand %p975_p5, %p1320_p4 }
 0x138   : > { %p981_p10 = por %p980_p11, %p979_p9 }
 0x139   : > { %p977_p6 = pneg %p976_p7 }
 0x13b   : > { %p982_p1 = pnand %p981_p10, %p977_p6 }
 0x13d   : > { %985 = shalt.err (!%p982_p1)
}
 0x13e   : > { %s1051_s24 = smov 128   ;;  %s1052_s30 = smov 8  }
 0x13f   : > { %835 = dma.vmem_to_hbm [thread:$0]  (%p1320_p4), %s1251_s29, 2048, %s1249_s21, %s560_s15, %s1051_s24, %s1051_s24, %s1052_s30  }
 0x140 PF: > { %p852_p8 = scmp.ge.s32.totalorder %s1044_s17, 2  ;;  %s589_s5 = sand.u32 1, %s1024_s12  }
 0x141   : > { %p1321_p12 = scmp.ne.s32.totalorder %s1312_s23, 0  ;;  %s590_s6 = scalar_lea.sflag [#allocation5], %s589_s5 }
 0x143   : > { %p846_p13 = pnand %p852_p8, %p1321_p12 }
 0x145   : > { %p847_p0 = pneg %p846_p13 }
 0x147   : > { %1019 = dma.done.wait (%p847_p0), %s590_s6, 2048  }
 0x148   : > { %1021 = vsyncadd (%p847_p0), %s590_s6, 4294965248  ;;  %s20_s17 = sadd.s32 1, %s1044_s17   ;;  %s1322_s12 = smov %s1028_s13 }
 0x149   : > { %p17_p2 = scmp.ge.s32.totalorder %s20_s17, 6   ;;  %s1323_s13 = smov %s1032_s14 }
 0x14a   : > { %s1324_s14 = smov %s1171_s19  ;;  %s1325_s15 = smov %s1040_s16 }
 0x14b   : > { %s1326_s16 = smov %s1328_s28  ;;  %19 = sbr.rel (!%p17_p2) target bundleno = 7 (0x7), region = 93 }
 0x150   :  { %595 = vsyncpa [#allocation4], 1 }
 0x151   :  { %597 = vsyncpa [#allocation4 + $0x1], 1 }
 0x152   :  { %598 = vsyncpa [#allocation7], 1 }
 0x153   :  { %599 = vsyncpa [#allocation5], 1 }
 0x154   :  { %601 = vsyncpa [#allocation5 + $0x1], 1 }

// kernel: tpu_custom_call.1
= control target key start
LH: loop header
LB: loop body
LE: loop exit
PB: predicated region body
PF: predicated region fallthrough
CT: control target
= control target key end

     0   :  { %8 = vsyncpa [#allocation4], 0  ;;  %s1302_s0 = inlined_call_operand.hbm [shape: f32[512,128], index: 0, kind: input, shape index: {}]   ;;  %s1303_s1 = inlined_call_operand.hbm [shape: f32[128,128], index: 1, kind: input, shape index: {}]   ;;  %s1304_s2 = inlined_call_operand.vmem [shape: f32[1,128], index: 2, kind: input, shape index: {}]   ;;  %s1305_s3 = inlined_call_operand.hbm [shape: f32[512,128], index: 3, kind: output, shape index: {}]  }
   0x1   :  { %10 = vsyncpa [#allocation4 + $0x1], 0 }
   0x2   :  { %11 = vsyncpa [#allocation7], 0 }
   0x3   :  { %12 = vsyncpa [#allocation5], 0 }
   0x4   :  { %14 = vsyncpa [#allocation5 + $0x1], 0  ;;  %s1073_s12 = smov 0   ;;  %s1075_s13 = smov 0  }
   0x5   :  { %s1077_s14 = smov 0   ;;  %s1079_s15 = smov 0  }
   0x6   :  { %s1081_s16 = smov 0   ;;  %s1083_s17 = smov 0  }
   0x7 LB: > { %s688_s18 = sadd.s32 4294967295, %s1044_s17   ;;  %s689_s19 = sadd.s32 4294967294, %s1044_s17   ;;  %s1044_s17 = sphi %s1083_s17, %s20_s17   ;;  %s1040_s16 = sphi %s1081_s16, %s1326_s16   ;;  %s1036_s15 = sphi %s1079_s15, %s1325_s15   ;;  %s1032_s14 = sphi %s1077_s14, %s1324_s14   ;;  %s1028_s13 = sphi %s1075_s13, %s1323_s13   ;;  %s1024_s12 = sphi %s1073_s12, %s1322_s12  }
   0x8   : > { %p61_p0 = scmp.ne.s32.totalorder %s1028_s13, %s1024_s12  ;;  %p1107_p1 = scmp.eq.s32.totalorder %s688_s18, 0 }
   0x9   : > { %p1111_p2 = scmp.eq.s32.totalorder %s688_s18, 3  ;;  %p147_p3 = scmp.eq.s32.totalorder %s689_s19, 3 }
   0xa   : > { %p1117_p4 = por %p1107_p1, %p61_p0  ;;  %p690_p5 = scmp.ge.s32.totalorder %s1044_s17, 1 }
   0xb   : > { %p1122_p6 = por %p147_p3, %p61_p0  ;;  %p154_p7 = scmp.lt.s32.totalorder %s1044_s17, 5 }
   0xc   : > { %s1046_s25 = smov [#allocation6]   ;;  %s39_s28 = sadd.s32 1, %s1040_s16 }
   0xd   : > { %s1312_s23 = scalar_select %p1122_p6, 1, 0 }
   0xe   : > { %p1127_p8 = pnand %p690_p5, %p154_p7  ;;  %s170_s26 = sshll.u32 %s1046_s25, 4  ;;  %s171_s26 = int_to_ptr.vmem [resolvable:$true] %s170_s26 }
   0xf   : > { %s917_s29 = scalar_lea.vmem %s171_s26, 2048  ;;  %p925_p3 = scmp.lt.s32.totalorder %s171_s26, %s171_s26 }
  0x10   : > { %p837_p9 = pneg %p1127_p8  ;;  %p918_p12 = scmp.ne.s32.totalorder %s171_s26, %s917_s29 }
  0x11   : > { %p926_p5 = scmp.lt.s32.totalorder %s917_s29, %s917_s29 }
  0x12   : > { %p1135_p10 = pnand %p837_p9, %p1107_p1 }
  0x13   : > { %p927_p7 = por %p926_p5, %p925_p3 }
  0x14   : > { %p908_p11 = pneg %p1135_p10 }
  0x16   : > { %p920_p13 = pnand %p918_p12, %p908_p11 }
  0x18   : > { %p921_p0 = pneg %p920_p13 }
  0x1a   : > { %p928_p6 = pnand %p927_p7, %p921_p0 }
  0x1c   : > { %931 = shalt.err (!%p928_p6)
}
  0x1d   : > { %s1306_s30 = smov 128   ;;  %s1307_s4 = smov 8  }
  0x1e   : > { %840 = dma.hbm_to_vmem [thread:$0]  (!%p1135_p10), %s1303_s1, 2048, %s171_s26, [#allocation7], %s1306_s30, %s1306_s30, %s1307_s4  }
  0x1f   : > { %p41_p6 = scmp.ge.s32.totalorder %s39_s28, 4  ;;  %s48_s7 = sadd.s32 1, %s1032_s14 }
  0x20   : > { %p55_p9 = scmp.ne.s32.totalorder %s1032_s14, %s1028_s13  ;;  %p56_p11 = scmp.eq.s32.totalorder %s1044_s17, 0 }
  0x21   : > { %s1328_s28 = smov (%p41_p6, %s39_s28), 0  ;;  %p850_p0 = scmp.lt.s32.totalorder %s1044_s17, 4 }
  0x22   : > { %p1156_p12 = por %p56_p11, %p55_p9  ;;  %p1162_p13 = por %p1111_p2, %p55_p9 }
  0x23   : > { %s43_s10 = ssub.s32 %s1040_s16, %s1328_s28  ;;  %s190_s11 = sand.u32 1, %s1032_s14  }
  0x24   : > { %s1316_s9 = scalar_select %p1162_p13, 1, 0 }
  0x25   : > { %p46_p10 = scmp.eq.s32.totalorder %s43_s10, 0  ;;  %s694_s18 = sshll.u32 %s190_s11, 7 }
  0x26   : > { %s707_s25 = sshll.u32 %s1040_s16, 11  ;;  %s194_s5 = scalar_lea.vmem [#allocation3], %s694_s18 }
  0x27   : > { %s1171_s19 = scalar_select %p46_p10, %s1032_s14, %s48_s7  }
  0x28   : > { %s201_s29 = scalar_lea.hbm %s1302_s0, %s707_s25  ;;  %s202_s6 = sshll.u32 %s194_s5, 4  ;;  %s203_s6 = int_to_ptr.vmem [resolvable:$true] %s202_s6 }
  0x29   : > { %p1179_p2 = pnand %p850_p0, %p1156_p12  ;;  %s191_s30 = scalar_lea.sflag [#allocation4], %s190_s11 }
  0x2a   : > { %s945_s10 = scalar_lea.vmem %s203_s6, 2048  ;;  %s1049_s7 = smov [#allocation3]  }
  0x2b   : > { %p934_p3 = pneg %p1179_p2  ;;  %p946_p5 = scmp.ne.s32.totalorder %s203_s6, %s945_s10 }
  0x2c   : > { %s950_s4 = sshll.u32 %s1049_s7, 4  ;;  %s951_s4 = int_to_ptr.vmem [resolvable:$false] %s950_s4 }
  0x2d   : > { %p948_p7 = pnand %p946_p5, %p934_p3  ;;  %s952_s25 = scalar_lea.vmem %s951_s4, 4096 }
  0x2e   : > { %p953_p9 = scmp.lt.s32.totalorder %s203_s6, %s951_s4  ;;  %p954_p11 = scmp.lt.s32.totalorder %s952_s25, %s945_s10 }
  0x2f   : > { %p949_p6 = pneg %p948_p7 }
  0x30   : > { %p955_p10 = por %p954_p11, %p953_p9 }
  0x32   : > { %p956_p13 = pnand %p955_p10, %p949_p6 }
  0x34   : > { %959 = shalt.err (!%p956_p13)
}
  0x35   : > { %s1318_s8 = smov 8   ;;  %s1319_s18 = smov 128  }
  0x36   : > { %844 = dma.hbm_to_vmem [thread:$0]  (!%p1179_p2), %s201_s29, 2048, %s203_s6, %s191_s30, %s1319_s18, %s1319_s18, %s1318_s8  }
  0x37   : > { %214 = sbr.rel (%p1127_p8) target bundleno = 320 (0x140), region = 32  ;;  %s1193_s11 = sand.u32 (!%p1127_p8), 1, %s1028_s13  }
  0x38   : > { %s698_s4 = sshll.u32 (!%p1127_p8), %s1193_s11, 7  ;;  %s217_s26 = scalar_lea.sflag (!%p1127_p8), [#allocation4], %s1193_s11 }
  0x39   : > { %s1199_s27 = scalar_lea.vmem (!%p1127_p8), [#allocation3], %s698_s4 }
  0x3c   : > { %1011 = dma.done.wait (%p1117_p4), %s217_s26, 2048  }
  0x3d   : > { %1013 = vsyncadd (%p1117_p4), %s217_s26, 4294965248 }
  0x3e   : > { %1015 = dma.done.wait (%p1107_p1), [#allocation7], 2048  }
  0x3f   : > { %1017 = vsyncadd (%p1107_p1), [#allocation7], 4294965248  ;;  %v323_v0 = vld [vmem:[#allocation6 + $0x78] sm:$0xff]  ;;  %v322_v1 = vld [vmem:[#allocation6 + $0x70] sm:$0xff]  ;;  %s1230_s24 = scalar_lea.vmem [#allocation8], %s698_s4  ;;  %s708_s30 = sshll.u32 %s1036_s15, 11 }
  0x40   : > { %741 = vmatprep.subr.mxu0 %v323_v0  ;;  %797 = vmatprep.subr.mxu1 %v323_v0  ;;  %v321_v2 = vld [vmem:[#allocation6 + $0x68] sm:$0xff]  ;;  %v320_v3 = vld [vmem:[#allocation6 + $0x60] sm:$0xff]  ;;  %v319_v4 = vld [vmem:[#allocation6 + $0x58] sm:$0xff]  ;;  %s574_s29 = sshll.u32 %s1230_s24, 4  ;;  %s1249_s21 = scalar_lea.hbm %s1305_s3, %s708_s30  ;;  %s1251_s29 = int_to_ptr.vmem [resolvable:$true] %s574_s29 }
  0x41   : > { %742 = vmatpush3.msra.mxu0 %v323_v0  ;;  %813 = vmatpush3.msra.mxu1 %v323_v0  ;;  %v318_v5 = vld [vmem:[#allocation6 + $0x50] sm:$0xff]  ;;  %v317_v6 = vld [vmem:[#allocation6 + $0x48] sm:$0xff]  ;;  %v316_v7 = vld [vmem:[#allocation6 + $0x40] sm:$0xff]  ;;  %s560_s15 = scalar_lea.sflag [#allocation5], %s1193_s11  ;;  %s960_s10 = scalar_lea.vmem %s1251_s29, 2048 }
  0x42   : > { %743 = vmatprep.subr.mxu0 %v322_v1  ;;  %798 = vmatprep.subr.mxu1 %v322_v1  ;;  %v315_v8 = vld [vmem:[#allocation6 + $0x38] sm:$0xff]  ;;  %v314_v9 = vld [vmem:[#allocation6 + $0x30] sm:$0xff]  ;;  %v313_v10 = vld [vmem:[#allocation6 + $0x28] sm:$0xff]  ;;  %p961_p1 = scmp.ne.s32.totalorder %s1251_s29, %s960_s10  ;;  %p1320_p4 = scmp.ne.s32.totalorder %s1316_s9, 0 }
  0x43   : > { %744 = vmatpush3.msra.mxu0 %v322_v1  ;;  %814 = vmatpush3.msra.mxu1 %v322_v1  ;;  %v312_v11 = vld [vmem:[#allocation6 + $0x20] sm:$0xff]  ;;  %v311_v12 = vld [vmem:[#allocation6 + $0x18] sm:$0xff]  ;;  %v310_v13 = vld [vmem:[#allocation6 + $0x10] sm:$0xff]  ;;  %s1050_s7 = smov [#allocation8]  }
  0x44   : > { %745 = vmatprep.subr.mxu0 %v321_v2  ;;  %799 = vmatprep.subr.mxu1 %v321_v2  ;;  %v309_v14 = vld [vmem:[#allocation6 + $0x8] sm:$0xff]  ;;  %v308_v15 = vld [vmem:[#allocation6] sm:$0xff]  ;;  %v294_v20 = vld [vmem:[%s1199_s27 + $0x10] sm:$0xff]  ;;  %p962_p8 = pnand %p961_p1, %p1320_p4  ;;  %s964_s25 = sshll.u32 %s1050_s7, 4  ;;  %s965_s25 = int_to_ptr.vmem [resolvable:$false] %s964_s25 }
  0x45   : > { %746 = vmatpush3.msra.mxu0 %v321_v2  ;;  %815 = vmatpush3.msra.mxu1 %v321_v2  ;;  %v292_v16 = vld [vmem:[%s1199_s27] sm:$0xff]  ;;  %v293_v18 = vld [vmem:[%s1199_s27 + $0x8] sm:$0xff]  ;;  %v302_v21 = vld [vmem:[%s1199_s27 + $0x50] sm:$0xff]  ;;  %s966_s8 = scalar_lea.vmem %s965_s25, 4096  ;;  %p967_p13 = scmp.lt.s32.totalorder %s1251_s29, %s965_s25 }
  0x46   : > { %747 = vmatprep.subr.mxu0 %v320_v3  ;;  %800 = vmatprep.subr.mxu1 %v320_v3  ;;  %v300_v17 = vld [vmem:[%s1199_s27 + $0x40] sm:$0xff]  ;;  %v301_v19 = vld [vmem:[%s1199_s27 + $0x48] sm:$0xff]  ;;  %v295_v22 = vld [vmem:[%s1199_s27 + $0x18] sm:$0xff]  ;;  %p963_p12 = pneg %p962_p8  ;;  %p968_p0 = scmp.lt.s32.totalorder %s966_s8, %s960_s10 }
  0x47   : > { %748 = vmatpush3.msra.mxu0 %v320_v3  ;;  %816 = vmatpush3.msra.mxu1 %v320_v3  ;;  %v303_v23 = vld [vmem:[%s1199_s27 + $0x58] sm:$0xff]  ;;  %v296_v24 = vld [vmem:[%s1199_s27 + $0x20] sm:$0xff]  ;;  %v297_v26 = vld [vmem:[%s1199_s27 + $0x28] sm:$0xff] }
  0x48   : > { %749 = vmatprep.subr.mxu0 %v319_v4  ;;  %801 = vmatprep.subr.mxu1 %v319_v4  ;;  %v304_v25 = vld [vmem:[%s1199_s27 + $0x60] sm:$0xff]  ;;  %v305_v27 = vld [vmem:[%s1199_s27 + $0x68] sm:$0xff]  ;;  %v298_v28 = vld [vmem:[%s1199_s27 + $0x30] sm:$0xff]  ;;  %p969_p2 = por %p968_p0, %p967_p13 }
  0x49   : > { %750 = vmatpush3.msra.mxu0 %v319_v4  ;;  %817 = vmatpush3.msra.mxu1 %v319_v4  ;;  %v306_v29 = vld [vmem:[%s1199_s27 + $0x70] sm:$0xff]  ;;  %v299_v30 = vld [vmem:[%s1199_s27 + $0x38] sm:$0xff]  ;;  %v701_v32 = vld [vmem:[%s1304_s2] ss:$0 sm:$0xff] }
  0x4a   : > { %751 = vmatprep.subr.mxu0 %v318_v5  ;;  %802 = vmatprep.subr.mxu1 %v318_v5  ;;  %v307_v31 = vld [vmem:[%s1199_s27 + $0x78] sm:$0xff]  ;;  %p970_p3 = pnand %p969_p2, %p963_p12 }
  0x4b   : > { %752 = vmatpush3.msra.mxu0 %v318_v5  ;;  %818 = vmatpush3.msra.mxu1 %v318_v5 }
  0x4c   : > { %753 = vmatprep.subr.mxu0 %v317_v6  ;;  %803 = vmatprep.subr.mxu1 %v317_v6 }
  0x4d   : > { %754 = vmatpush3.msra.mxu0 %v317_v6  ;;  %819 = vmatpush3.msra.mxu1 %v317_v6 }
  0x4e   : > { %755 = vmatprep.subr.mxu0 %v316_v7  ;;  %804 = vmatprep.subr.mxu1 %v316_v7 }
  0x4f   : > { %756 = vmatpush3.msra.mxu0 %v316_v7  ;;  %820 = vmatpush3.msra.mxu1 %v316_v7 }
  0x50   : > { %757 = vmatprep.subr.mxu0 %v315_v8  ;;  %805 = vmatprep.subr.mxu1 %v315_v8 }
  0x51   : > { %758 = vmatpush3.msra.mxu0 %v315_v8  ;;  %821 = vmatpush3.msra.mxu1 %v315_v8 }
  0x52   : > { %759 = vmatprep.subr.mxu0 %v314_v9  ;;  %806 = vmatprep.subr.mxu1 %v314_v9 }
  0x53   : > { %760 = vmatpush3.msra.mxu0 %v314_v9  ;;  %822 = vmatpush3.msra.mxu1 %v314_v9 }
  0x54   : > { %761 = vmatprep.subr.mxu0 %v313_v10  ;;  %807 = vmatprep.subr.mxu1 %v313_v10 }
  0x55   : > { %762 = vmatpush3.msra.mxu0 %v313_v10  ;;  %823 = vmatpush3.msra.mxu1 %v313_v10 }
  0x56   : > { %763 = vmatprep.subr.mxu0 %v312_v11  ;;  %808 = vmatprep.subr.mxu1 %v312_v11 }
  0x57   : > { %764 = vmatpush3.msra.mxu0 %v312_v11  ;;  %824 = vmatpush3.msra.mxu1 %v312_v11 }
  0x58   : > { %765 = vmatprep.subr.mxu0 %v311_v12  ;;  %809 = vmatprep.subr.mxu1 %v311_v12 }
  0x59   : > { %766 = vmatpush3.msra.mxu0 %v311_v12  ;;  %825 = vmatpush3.msra.mxu1 %v311_v12 }
  0x5a   : > { %767 = vmatprep.subr.mxu0 %v310_v13  ;;  %810 = vmatprep.subr.mxu1 %v310_v13 }
  0x5b   : > { %768 = vmatpush3.msra.mxu0 %v310_v13  ;;  %826 = vmatpush3.msra.mxu1 %v310_v13 }
  0x5c   : > { %769 = vmatprep.subr.mxu0 %v309_v14  ;;  %811 = vmatprep.subr.mxu1 %v309_v14 }
  0x5d   : > { %770 = vmatpush3.msra.mxu0 %v309_v14  ;;  %827 = vmatpush3.msra.mxu1 %v309_v14 }
  0x5e   : > { %771 = vmatprep.subr.mxu0 %v308_v15  ;;  %812 = vmatprep.subr.mxu1 %v308_v15 }
  0x5f   : > { %772 = vmatpush3.msra.mxu0 %v308_v15  ;;  %828 = vmatpush3.msra.mxu1 %v308_v15 }
  0x60   : > { %773 = vmatprep.mubr.f32.mxu0 %v292_v16  ;;  %785 = vmatprep.mubr.f32.mxu1 %v300_v17 }
  0x61   : > { %774 = vmatmul.mubr.f32.vlgmr.msra.gmra.mxu0 %v293_v18  ;;  %786 = vmatmul.mubr.f32.vlgmr.msra.gmra.mxu1 %v301_v19 }
  0x62   : > { %776 = vmatprep.mubr.f32.mxu0 %v294_v20  ;;  %788 = vmatprep.mubr.f32.mxu1 %v302_v21 }
  0x65   : > { %777 = vmatmul.mubr.f32.gmra.mxu0 %v295_v22  ;;  %789 = vmatmul.mubr.f32.gmra.mxu1 %v303_v23 }
  0x66   : > { %779 = vmatprep.mubr.f32.mxu0 %v296_v24  ;;  %791 = vmatprep.mubr.f32.mxu1 %v304_v25 }
  0x69   : > { %780 = vmatmul.mubr.f32.gmra.mxu0 %v297_v26  ;;  %792 = vmatmul.mubr.f32.gmra.mxu1 %v305_v27 }
  0x6a   : > { %782 = vmatprep.mubr.f32.mxu0 %v298_v28  ;;  %794 = vmatprep.mubr.f32.mxu1 %v306_v29 }
  0x6d   : > { %783 = vmatmul.mubr.f32.gmra.mxu0 %v299_v30  ;;  %795 = vmatmul.mubr.f32.gmra.mxu1 %v307_v31 }
 0x121   : > { %v775_v33 = vpop.f32.mrf.mxu0  ;;  %v787_v34 = vpop.f32.mrf.mxu1 }
 0x122   : > { %v528_v35 = vadd.f32 %v775_v33, %v701_v32  ;;  %v536_v36 = vadd.f32 %v787_v34, %v701_v32 }
 0x123   : > { %v390_v37 = vpop.f32.mrf.mxu0  ;;  %v430_v38 = vpop.f32.mrf.mxu1 }
 0x124   : > { %544 = vst [vmem:[%s1230_s24 + $0x8] sm:$0xff] %v528_v35  ;;  %552 = vst [vmem:[%s1230_s24 + $0x48] sm:$0xff] %v536_v36  ;;  %v527_v39 = vadd.f32 %v701_v32, %v390_v37  ;;  %v535_v40 = vadd.f32 %v701_v32, %v430_v38 }
 0x125   : > { %v778_v41 = vpop.f32.mrf.mxu0  ;;  %v790_v42 = vpop.f32.mrf.mxu1 }
 0x126   : > { %543 = vst [vmem:[%s1230_s24] sm:$0xff] %v527_v39  ;;  %551 = vst [vmem:[%s1230_s24 + $0x40] sm:$0xff] %v535_v40  ;;  %v530_v43 = vadd.f32 %v778_v41, %v701_v32  ;;  %v538_v44 = vadd.f32 %v790_v42, %v701_v32 }
 0x127   : > { %v400_v45 = vpop.f32.mrf.mxu0  ;;  %v440_v46 = vpop.f32.mrf.mxu1 }
 0x128   : > { %546 = vst [vmem:[%s1230_s24 + $0x18] sm:$0xff] %v530_v43  ;;  %554 = vst [vmem:[%s1230_s24 + $0x58] sm:$0xff] %v538_v44  ;;  %v529_v47 = vadd.f32 %v701_v32, %v400_v45  ;;  %v537_v48 = vadd.f32 %v701_v32, %v440_v46 }
 0x129   : > { %v781_v49 = vpop.f32.mrf.mxu0  ;;  %v793_v50 = vpop.f32.mrf.mxu1 }
 0x12a   : > { %545 = vst [vmem:[%s1230_s24 + $0x10] sm:$0xff] %v529_v47  ;;  %553 = vst [vmem:[%s1230_s24 + $0x50] sm:$0xff] %v537_v48  ;;  %v532_v51 = vadd.f32 %v781_v49, %v701_v32  ;;  %v540_v52 = vadd.f32 %v793_v50, %v701_v32 }
 0x12b   : > { %v410_v53 = vpop.f32.mrf.mxu0  ;;  %v450_v54 = vpop.f32.mrf.mxu1 }
 0x12c   : > { %548 = vst [vmem:[%s1230_s24 + $0x28] sm:$0xff] %v532_v51  ;;  %556 = vst [vmem:[%s1230_s24 + $0x68] sm:$0xff] %v540_v52  ;;  %v531_v55 = vadd.f32 %v701_v32, %v410_v53  ;;  %v539_v56 = vadd.f32 %v701_v32, %v450_v54 }
 0x12d   : > { %v784_v57 = vpop.f32.mrf.mxu0  ;;  %v796_v58 = vpop.f32.mrf.mxu1 }
 0x12e   : > { %547 = vst [vmem:[%s1230_s24 + $0x20] sm:$0xff] %v531_v55  ;;  %555 = vst [vmem:[%s1230_s24 + $0x60] sm:$0xff] %v539_v56  ;;  %v534_v59 = vadd.f32 %v784_v57, %v701_v32  ;;  %v542_v60 = vadd.f32 %v796_v58, %v701_v32 }
 0x12f   : > { %v420_v61 = vpop.f32.mrf.mxu0  ;;  %v460_v62 = vpop.f32.mrf.mxu1 }
 0x130   : > { %550 = vst [vmem:[%s1230_s24 + $0x38] sm:$0xff] %v534_v59  ;;  %558 = vst [vmem:[%s1230_s24 + $0x78] sm:$0xff] %v542_v60  ;;  %v533_v63 = vadd.f32 %v701_v32, %v420_v61  ;;  %v541_v0 = vadd.f32 %v701_v32, %v460_v62 }
 0x132   : > { %549 = vst [vmem:[%s1230_s24 + $0x30] sm:$0xff] %v533_v63  ;;  %557 = vst [vmem:[%s1230_s24 + $0x70] sm:$0xff] %v541_v0 }
 0x133   : > { %973 = shalt.err (!%p970_p3)
}
 0x134   : > { %s974_s18 = scalar_lea.hbm %s1249_s21, 2048  ;;  %s978_s27 = scalar_lea.hbm %s1305_s3, 8192 }
 0x135   : > { %p975_p5 = scmp.ne.s32.totalorder %s1249_s21, %s974_s18  ;;  %p979_p9 = scmp.lt.s32.totalorder %s1249_s21, %s1305_s3 }
 0x136   : > { %p980_p11 = scmp.lt.s32.totalorder %s978_s27, %s974_s18 }
 0x137   : > { %p976_p7 = pnand %p975_p5, %p1320_p4 }
 0x138   : > { %p981_p10 = por %p980_p11, %p979_p9 }
 0x139   : > { %p977_p6 = pneg %p976_p7 }
 0x13b   : > { %p982_p1 = pnand %p981_p10, %p977_p6 }
 0x13d   : > { %985 = shalt.err (!%p982_p1)
}
 0x13e   : > { %s1051_s24 = smov 128   ;;  %s1052_s30 = smov 8  }
 0x13f   : > { %835 = dma.vmem_to_hbm [thread:$0]  (%p1320_p4), %s1251_s29, 2048, %s1249_s21, %s560_s15, %s1051_s24, %s1051_s24, %s1052_s30  }
 0x140 PF: > { %p852_p8 = scmp.ge.s32.totalorder %s1044_s17, 2  ;;  %s589_s5 = sand.u32 1, %s1024_s12  }
 0x141   : > { %p1321_p12 = scmp.ne.s32.totalorder %s1312_s23, 0  ;;  %s590_s6 = scalar_lea.sflag [#allocation5], %s589_s5 }
 0x143   : > { %p846_p13 = pnand %p852_p8, %p1321_p12 }
 0x145   : > { %p847_p0 = pneg %p846_p13 }
 0x147   : > { %1019 = dma.done.wait (%p847_p0), %s590_s6, 2048  }
 0x148   : > { %1021 = vsyncadd (%p847_p0), %s590_s6, 4294965248  ;;  %s20_s17 = sadd.s32 1, %s1044_s17   ;;  %s1322_s12 = smov %s1028_s13 }
 0x149   : > { %p17_p2 = scmp.ge.s32.totalorder %s20_s17, 6   ;;  %s1323_s13 = smov %s1032_s14 }
 0x14a   : > { %s1324_s14 = smov %s1171_s19  ;;  %s1325_s15 = smov %s1040_s16 }
 0x14b   : > { %s1326_s16 = smov %s1328_s28  ;;  %19 = sbr.rel (!%p17_p2) target bundleno = 7 (0x7), region = 93 }
 0x150   :  { %595 = vsyncpa [#allocation4], 1 }
 0x151   :  { %597 = vsyncpa [#allocation4 + $0x1], 1 }
 0x152   :  { %598 = vsyncpa [#allocation7], 1 }
 0x153   :  { %599 = vsyncpa [#allocation5], 1 }
 0x154   :  { %601 = vsyncpa [#allocation5 + $0x1], 1 }

</bundles_post_ra>
